<compile_context>
chip_gen: v6e
topology: v6e:2x2x1
jax: 0.10.0
libtpu: 0.0.40
codegen_flags: <defaults>
</compile_context>

<pallas_src>
import functools

import jax
import jax.numpy as jnp
from jax import lax
from jax.experimental import pallas as pl
from jax.experimental.pallas import tpu as pltpu


def ecr_kernel(m_ref, out_ref, *, sinkhorn_alpha, weight_loss_ecr,
               stop_thr, max_iter, epsilon):
    M = m_ref[...].astype(jnp.float32)                 # (n, m) cost matrix
    n, m = M.shape
    K = jnp.exp(-M * sinkhorn_alpha)                   # (n, m)

    a = jnp.float32(1.0 / n)                           # uniform row marginal (value)
    b = jnp.float32(1.0 / m)                           # uniform col marginal (value)

    # Row-vector layout for u and v (no transposes needed anywhere).
    u0 = jnp.full((1, n), 1.0 / n, dtype=jnp.float32)  # torch: ones_like(a)/a.size(0)
    v0 = jnp.zeros((1, m), dtype=jnp.float32)          # placeholder (loop always runs)

    dn_inner = (((1,), (0,)), ((), ()))                # (1,n)@(n,m) -> (1,m)
    dn_last = (((1,), (1,)), ((), ()))                 # (1,m)·(n,m) over m -> (1,n)

    def ktu_row(u_row):
        # (K^T u) as a row vector, on the MXU: (1, n) @ (n, m) -> (1, m).
        return lax.dot_general(u_row, K, dn_inner,
                               preferred_element_type=jnp.float32)

    def kv_row(v_row):
        # (K v) as a row vector, on the MXU: contract (1, m) with (n, m) over m.
        return lax.dot_general(v_row, K, dn_last,
                               preferred_element_type=jnp.float32)

    def cond_fn(carry):
        _, _, err, cpt = carry
        return jnp.logical_and(err > stop_thr, cpt < max_iter)

    def body_fn(carry):
        u, _, err, cpt = carry
        # v = b / (K^T u + eps);  u = a / (K v + eps)   (EUP approx reciprocal)
        v = b * pl.reciprocal(ktu_row(u) + epsilon, approx=True)      # (1, m)
        u_new = a * pl.reciprocal(kv_row(v) + epsilon, approx=True)   # (1, n)
        cpt_new = cpt + 1
        # Error is only refreshed when cpt % 50 == 1, exactly like the PyTorch
        # loop; lax.cond skips the extra K^T u pass on the other 49 iterations.
        err_new = lax.cond(
            cpt_new % 50 == 1,
            lambda: jnp.sum(jnp.abs(v * ktu_row(u_new) - b)),
            lambda: err)
        return (u_new, v, err_new, cpt_new)

    u, v, _, _ = lax.while_loop(
        cond_fn, body_fn, (u0, v0, jnp.float32(1.0), jnp.int32(0)))

    # loss = weight * sum_ij u_i * K_ij * v_j * M_ij
    km = K * M                                                        # (n, m)
    row = lax.dot_general(u, km, dn_inner,
                          preferred_element_type=jnp.float32)         # (1, m)
    out_ref[0, 0] = jnp.sum(row * v) * weight_loss_ecr


def ecr_loss_pallas(M, *, weight_loss_ECR, sinkhorn_alpha,
                    OT_max_iter=5000, stopThr=0.005):
    kernel = functools.partial(
        ecr_kernel,
        sinkhorn_alpha=float(sinkhorn_alpha),
        weight_loss_ecr=float(weight_loss_ECR),
        stop_thr=float(stopThr),
        max_iter=int(OT_max_iter),
        epsilon=1e-16,
    )
    # Size scoped VMEM explicitly: M, K, K*M (all f32) + input buffer + headroom.
    nm_bytes = int(M.shape[0]) * int(M.shape[1]) * 4
    vmem_limit = min(max(5 * nm_bytes + (4 << 20), 32 << 20), 64 << 20)
    out = pl.pallas_call(
        kernel,
        out_shape=jax.ShapeDtypeStruct((1, 1), jnp.float32),
        in_specs=[pl.BlockSpec(memory_space=pltpu.MemorySpace.VMEM)],
        out_specs=pl.BlockSpec(memory_space=pltpu.MemorySpace.SMEM),
        compiler_params=pltpu.CompilerParams(vmem_limit_bytes=vmem_limit),
    )(M)  # cast to f32 happens inside the kernel (no extra HBM copy)
    return out[0, 0]


def ecr_loss_ref(M, *, weight_loss_ECR, sinkhorn_alpha,
                 OT_max_iter=5000, stopThr=0.005):
    """Pure-JAX reference mirroring the PyTorch forward (for sanity check)."""
    epsilon = 1e-16
    n, m = M.shape
    a = jnp.full((n, 1), 1.0 / n, dtype=jnp.float32)
    b = jnp.full((m, 1), 1.0 / m, dtype=jnp.float32)
    u0 = jnp.full((n, 1), 1.0 / n, dtype=jnp.float32)
    v0 = jnp.zeros((m, 1), dtype=jnp.float32)
    K = jnp.exp(-M * sinkhorn_alpha)

    def cond(carry):
        _, _, err, cpt = carry
        return jnp.logical_and(err > stopThr, cpt < OT_max_iter)

    def body(carry):
        u, _, err, cpt = carry
        v = b / (K.T @ u + epsilon)
        u_new = a / (K @ v + epsilon)
        cpt_new = cpt + 1
        bb = v * (K.T @ u_new)
        err_candidate = jnp.sum(jnp.abs(bb - b))
        err_new = jnp.where(cpt_new % 50 == 1, err_candidate, err)
        return (u_new, v, err_new, cpt_new)

    u, v, _, _ = lax.while_loop(cond, body, (u0, v0, jnp.float32(1.0), jnp.int32(0)))
    transp = u * (K * v.T)
    return jnp.sum(transp * M) * weight_loss_ECR


if __name__ == "__main__":
    key = jax.random.PRNGKey(0)
    n_topics, vocab = 32, 256
    # Deterministic, non-negative "distance-like" cost matrix.
    M = jax.random.uniform(key, (n_topics, vocab), dtype=jnp.float32)

    # Hyperparameters of the module (no learned weights in ECR).
    weight_loss_ECR = 100.0
    sinkhorn_alpha = 20.0

    loss = ecr_loss_pallas(M, weight_loss_ECR=weight_loss_ECR,
                           sinkhorn_alpha=sinkhorn_alpha)
    loss = jax.block_until_ready(loss)

    ref = ecr_loss_ref(M, weight_loss_ECR=weight_loss_ECR,
                       sinkhorn_alpha=sinkhorn_alpha)
    ref = jax.block_until_ready(ref)

    assert jnp.isfinite(loss), "non-finite loss"
    assert abs(float(loss) - float(ref)) <= 5e-2 * max(1.0, abs(float(ref))), (
        f"mismatch: pallas={float(loss)} ref={float(ref)}")
    print("KERNEL_OK")
</pallas_src>

<mosaic_0001>
module attributes {stable_mosaic.version = 11 : i64} {
  func.func @ecr_kernel(%arg0: memref<32x256xf32, #tpu.memory_space<vmem>>, %arg1: memref<1x1xf32, #tpu.memory_space<smem>>) attributes {dimension_semantics = [], scalar_prefetch = 0 : i64, scratch_operands = 0 : i64, tpu.core_type = #tpu.core_type<tc>} {
    %c0 = arith.constant 0 : index
    %c0_0 = arith.constant 0 : index
    %0 = vector.load %arg0[%c0, %c0_0] : memref<32x256xf32, #tpu.memory_space<vmem>>, vector<32x256xf32>
    %cst = arith.constant 0.000000e+00 : f32
    %1 = vector.broadcast %cst : f32 to vector<32x256xf32>
    %2 = arith.subf %1, %0 : vector<32x256xf32>
    %cst_1 = arith.constant 2.000000e+01 : f32
    %3 = vector.broadcast %cst_1 : f32 to vector<32x256xf32>
    %4 = arith.mulf %2, %3 : vector<32x256xf32>
    %5 = math.exp %4 : vector<32x256xf32>
    %cst_2 = arith.constant 3.125000e-02 : f32
    %6 = vector.broadcast %cst_2 : f32 to vector<1x32xf32>
    %cst_3 = arith.constant 0.000000e+00 : f32
    %7 = vector.broadcast %cst_3 : f32 to vector<1x256xf32>
    %cst_4 = arith.constant 3.906250e-03 : f32
    %cst_5 = arith.constant 3.125000e-02 : f32
    %cst_6 = arith.constant 1.000000e+00 : f32
    %c0_i32 = arith.constant 0 : i32
    %8:4 = scf.while (%arg2 = %6, %arg3 = %7, %arg4 = %cst_6, %arg5 = %c0_i32) : (vector<1x32xf32>, vector<1x256xf32>, f32, i32) -> (vector<1x32xf32>, vector<1x256xf32>, f32, i32) {
      %cst_12 = arith.constant 5.000000e-03 : f32
      %18 = arith.cmpf ogt, %arg4, %cst_12 : f32
      %c5000_i32 = arith.constant 5000 : i32
      %19 = arith.cmpi slt, %arg5, %c5000_i32 : i32
      %20 = arith.andi %18, %19 : i1
      scf.condition(%20) %arg2, %arg3, %arg4, %arg5 : vector<1x32xf32>, vector<1x256xf32>, f32, i32
    } do {
    ^bb0(%arg2: vector<1x32xf32>, %arg3: vector<1x256xf32>, %arg4: f32, %arg5: i32):
      %cst_12 = arith.constant dense<0.000000e+00> : vector<1x256xf32>
      %18 = tpu.matmul %arg2, %5, %cst_12 {dimension_numbers = #tpu.dot_dimension_numbers<[1], [0], [0], [1], [0, 0, 1, 1], [], []>} : vector<1x32xf32>, vector<32x256xf32>, vector<1x256xf32> -> vector<1x256xf32>
      %cst_13 = arith.constant 1.000000e-16 : f32
      %19 = vector.broadcast %cst_13 : f32 to vector<1x256xf32>
      %20 = arith.addf %18, %19 : vector<1x256xf32>
      %21 = tpu.reciprocal %20 {approx = true} : vector<1x256xf32> -> vector<1x256xf32>
      %22 = vector.broadcast %cst_4 : f32 to vector<1x256xf32>
      %23 = arith.mulf %22, %21 : vector<1x256xf32>
      %cst_14 = arith.constant dense<0.000000e+00> : vector<1x32xf32>
      %24 = tpu.matmul %23, %5, %cst_14 {dimension_numbers = #tpu.dot_dimension_numbers<[1], [1], [0], [0], [0, 0, 1, 0], [], []>} : vector<1x256xf32>, vector<32x256xf32>, vector<1x32xf32> -> vector<1x32xf32>
      %cst_15 = arith.constant 1.000000e-16 : f32
      %25 = vector.broadcast %cst_15 : f32 to vector<1x32xf32>
      %26 = arith.addf %24, %25 : vector<1x32xf32>
      %27 = tpu.reciprocal %26 {approx = true} : vector<1x32xf32> -> vector<1x32xf32>
      %28 = vector.broadcast %cst_5 : f32 to vector<1x32xf32>
      %29 = arith.mulf %28, %27 : vector<1x32xf32>
      %c1_i32 = arith.constant 1 : i32
      %30 = arith.addi %arg5, %c1_i32 : i32
      %c50_i32 = arith.constant 50 : i32
      %c0_i32_16 = arith.constant 0 : i32
      %31 = arith.cmpi eq, %c50_i32, %c0_i32_16 : i32
      %c1_i32_17 = arith.constant 1 : i32
      %32 = arith.select %31, %c1_i32_17, %c50_i32 : i32
      %33 = arith.remsi %30, %32 : i32
      %c0_i32_18 = arith.constant 0 : i32
      %34 = arith.cmpi ne, %33, %c0_i32_18 : i32
      %c0_i32_19 = arith.constant 0 : i32
      %35 = arith.cmpi slt, %33, %c0_i32_19 : i32
      %c0_i32_20 = arith.constant 0 : i32
      %36 = arith.cmpi slt, %32, %c0_i32_20 : i32
      %37 = arith.xori %35, %36 : i1
      %38 = arith.andi %37, %34 : i1
      %39 = arith.addi %33, %32 : i32
      %40 = arith.select %38, %39, %33 : i32
      %c1_i32_21 = arith.constant 1 : i32
      %41 = arith.cmpi eq, %40, %c1_i32_21 : i32
      %42 = arith.extui %41 : i1 to i32
      %c0_i32_22 = arith.constant 0 : i32
      %43 = arith.cmpi ne, %42, %c0_i32_22 : i32
      %44 = scf.if %43 -> (f32) {
        %cst_23 = arith.constant dense<0.000000e+00> : vector<1x256xf32>
        %45 = tpu.matmul %29, %5, %cst_23 {dimension_numbers = #tpu.dot_dimension_numbers<[1], [0], [0], [1], [0, 0, 1, 1], [], []>} : vector<1x32xf32>, vector<32x256xf32>, vector<1x256xf32> -> vector<1x256xf32>
        %46 = arith.mulf %23, %45 : vector<1x256xf32>
        %47 = vector.broadcast %cst_4 : f32 to vector<1x256xf32>
        %48 = arith.subf %46, %47 : vector<1x256xf32>
        %49 = math.absf %48 : vector<1x256xf32>
        %50 = vector.shape_cast %49 : vector<1x256xf32> to vector<1x1x256xf32>
        %cst_24 = arith.constant dense<0.000000e+00> : vector<1xf32>
        %51 = vector.multi_reduction <add>, %50, %cst_24 [1, 2] : vector<1x1x256xf32> to vector<1xf32>
        %52 = vector.shape_cast %51 : vector<1xf32> to vector<1x1x1xf32>
        %53 = vector.extract %52[0, 0, 0] : f32 from vector<1x1x1xf32>
        scf.yield %53 : f32
      } else {
        scf.yield %arg4 : f32
      }
      scf.yield %29, %23, %44, %30 : vector<1x32xf32>, vector<1x256xf32>, f32, i32
    }
    %9 = arith.mulf %5, %0 : vector<32x256xf32>
    %cst_7 = arith.constant dense<0.000000e+00> : vector<1x256xf32>
    %10 = tpu.matmul %8#0, %9, %cst_7 {dimension_numbers = #tpu.dot_dimension_numbers<[1], [0], [0], [1], [0, 0, 1, 1], [], []>} : vector<1x32xf32>, vector<32x256xf32>, vector<1x256xf32> -> vector<1x256xf32>
    %11 = arith.mulf %10, %8#1 : vector<1x256xf32>
    %12 = vector.shape_cast %11 : vector<1x256xf32> to vector<1x1x256xf32>
    %cst_8 = arith.constant dense<0.000000e+00> : vector<1xf32>
    %13 = vector.multi_reduction <add>, %12, %cst_8 [1, 2] : vector<1x1x256xf32> to vector<1xf32>
    %14 = vector.shape_cast %13 : vector<1xf32> to vector<1x1x1xf32>
    %15 = vector.extract %14[0, 0, 0] : f32 from vector<1x1x1xf32>
    %cst_9 = arith.constant 1.000000e+02 : f32
    %16 = arith.mulf %15, %cst_9 : f32
    %c0_10 = arith.constant 0 : index
    %c0_11 = arith.constant 0 : index
    %17 = memref.load %arg1[%c0_10, %c0_11] : memref<1x1xf32, #tpu.memory_space<smem>>
    memref.store %16, %arg1[%c0_10, %c0_11] : memref<1x1xf32, #tpu.memory_space<smem>>
    return
  }
}

</mosaic_0001>

<bundles_post_ra>
// kernel: tpu_custom_call.1
= control target key start
LH: loop header
LB: loop body
LE: loop exit
PB: predicated region body
PF: predicated region fallthrough
CT: control target
= control target key end

     0   :  { %6 = vsyncpa [#allocation3], 0  ;;  %s781_s0 = inlined_call_operand.hbm [shape: f32[32,256], index: 0, kind: input, shape index: {}]   ;;  %s782_s1 = inlined_call_operand.hbm [shape: f32[1,1], index: 1, kind: output, shape index: {}]  }
   0x1   :  { %7 = vsyncpa [#allocation4], 0  ;;  %s620_s6 = smov [#allocation2]  }
   0x2   :  { %s13_s7 = sshll.u32 %s620_s6, 4  ;;  %s14_s7 = int_to_ptr.vmem [resolvable:$true] %s13_s7 }
   0x3   :  { %s564_s8 = scalar_lea.vmem %s14_s7, 1024  ;;  %p569_p1 = scmp.lt.s32.totalorder %s14_s7, %s14_s7 }
   0x4   :  { %p565_p0 = scmp.ne.s32.totalorder %s14_s7, %s564_s8  ;;  %p570_p2 = scmp.lt.s32.totalorder %s564_s8, %s564_s8 }
   0x6   :  { %p571_p3 = por %p570_p2, %p569_p1 }
   0x8   :  { %p572_p4 = pnand %p571_p3, %p565_p0 }
   0xa   :  { %575 = shalt.err (!%p572_p4)
}
   0xb   :  { %s621_s9 = smov 256   ;;  %s622_s10 = smov 16  }
   0xc   :  { %19 = dma.hbm_to_vmem [thread:$0]  %s781_s0, 1024, %s14_s7, [#allocation3], %s621_s9, %s621_s9, %s622_s10  }
   0xd   :  { %600 = dma.done.wait [#allocation3], 1024  }
   0xe   :  { %601 = vsyncadd [#allocation3], 4294966272  ;;  %v640_v0 = vld [vmem:[#allocation2] sm:$0xff]  ;;  %v642_v1 = vld [vmem:[#allocation2 + $0x8] sm:$0xff]  ;;  %s680_s0 = smov 0   ;;  %s682_s13 = smov 1.0  }
   0xf   :  { %v644_v2 = vld [vmem:[#allocation2 + $0x10] sm:$0xff]  ;;  %v646_v3 = vld [vmem:[#allocation2 + $0x18] sm:$0xff]  ;;  %v648_v4 = vld [vmem:[#allocation2 + $0x20] sm:$0xff]  ;;  %v31_v6 = vsub.f32 0.0, %v640_v0  ;;  %v32_v7 = vsub.f32 0.0, %v642_v1  ;;  %v684_v40 = vmov 0.03125  }
  0x10   :  { %v650_v5 = vld [vmem:[#allocation2 + $0x28] sm:$0xff]  ;;  %v33_v8 = vsub.f32 0.0, %v644_v2  ;;  %v655_v9 = vld [vmem:[#allocation2 + $0x30] sm:$0xff]  ;;  %v657_v10 = vld [vmem:[#allocation2 + $0x38] sm:$0xff]  ;;  %v34_v11 = vsub.f32 0.0, %v646_v3  ;;  %v35_v12 = vsub.f32 0.0, %v648_v4 }
  0x11   :  { %v36_v13 = vsub.f32 0.0, %v650_v5  ;;  %v37_v14 = vsub.f32 0.0, %v655_v9  ;;  %v38_v15 = vsub.f32 0.0, %v657_v10  ;;  %v39_v16 = vmul.f32 20.0, %v31_v6 }
  0x12   :  { %v40_v17 = vmul.f32 20.0, %v32_v7  ;;  %v41_v18 = vmul.f32 20.0, %v33_v8  ;;  %v42_v19 = vmul.f32 20.0, %v34_v11  ;;  %v43_v20 = vmul.f32 20.0, %v35_v12 }
  0x13   :  { %v44_v21 = vmul.f32 20.0, %v36_v13  ;;  %v45_v22 = vmul.f32 20.0, %v37_v14  ;;  %v47_v23 = vmul.f32 1.442695, %v39_v16  ;;  %v46_v25 = vmul.f32 20.0, %v38_v15 }
  0x14   :  { %v49_v24 = vmul.f32 1.442695, %v40_v17  ;;  %v51_v26 = vmul.f32 1.442695, %v41_v18  ;;  %v53_v27 = vmul.f32 1.442695, %v42_v19 }
  0x15   :  { %532 = vpow2.f32 %v47_v23  ;;  %v55_v28 = vmul.f32 1.442695, %v43_v20  ;;  %v57_v29 = vmul.f32 1.442695, %v44_v21  ;;  %v59_v30 = vmul.f32 1.442695, %v45_v22 }
  0x16   :  { %534 = vpow2.f32 %v49_v24  ;;  %v61_v31 = vmul.f32 1.442695, %v46_v25 }
  0x17   :  { %536 = vpow2.f32 %v51_v26 }
  0x18   :  { %538 = vpow2.f32 %v53_v27 }
  0x19   :  { %540 = vpow2.f32 %v55_v28 }
  0x1a   :  { %542 = vpow2.f32 %v57_v29 }
  0x1b   :  { %544 = vpow2.f32 %v59_v30 }
  0x1c   :  { %546 = vpow2.f32 %v61_v31 }
  0x22   :  { %v664_v32 = vpop.eup %532 }
  0x23   :  { %v666_v33 = vpop.eup %534 }
  0x24   :  { %v668_v34 = vpop.eup %536 }
  0x25   :  { %v670_v35 = vpop.eup %538 }
  0x26   :  { %v672_v36 = vpop.eup %540 }
  0x27   :  { %v674_v37 = vpop.eup %542 }
  0x28   :  { %v676_v38 = vpop.eup %544 }
  0x29   :  { %v678_v39 = vpop.eup %546 }
  0x2a LB: > { %103 = vmatprep.subr.mxu0 %v678_v39  ;;  %178 = vmatprep.subr.mxu1 %v678_v39  ;;  %v623_v41 = vmov 0.0   ;;  %vm75_vm0 = vcmask 261120   ;;  %s717_s0 = sadd.s32 1, %s606_s0   ;;  %s727_s19 = smov 0   ;;  %v614_v40 = vphi %v684_v40, %v784_v40   ;;  %s610_s13 = sphi %s682_s13, %s790_s13   ;;  %s606_s0 = sphi %s680_s0, %s717_s0  }
  0x2b   : > { %104 = vmatpush1.msra.mxu0 %v676_v38  ;;  %143 = vmatprep.mubr.f32.mxu0 %v623_v41  ;;  %s228_s14 = ssub.s32 0, %s717_s0  ;;  %p227_p5 = scmp.lt.s32.totalorder %s717_s0, 0 }
  0x2c   : > { %105 = vmatprep.subr.mxu0 %v674_v37  ;;  %179 = vmatpush1.xpose.msra.mxu1 %v676_v38  ;;  %s477_s15 = smin.u32 %s228_s14, %s717_s0 }
  0x2d   : > { %106 = vmatpush1.msra.mxu0 %v672_v36  ;;  %180 = vmatprep.subr.mxu1 %v674_v37  ;;  %548 = sdivrem.u32 %s477_s15, 50 }
  0x2e   : > { %107 = vmatprep.subr.mxu0 %v670_v35 }
  0x2f   : > { %108 = vmatpush1.msra.mxu0 %v668_v34 }
  0x30   : > { %109 = vmatprep.subr.mxu0 %v666_v33  ;;  %181 = vmatpush1.xpose.msra.mxu1 %v672_v36 }
  0x31   : > { %110 = vmatpush1.msra.mxu0 %v664_v32  ;;  %182 = vmatprep.subr.mxu1 %v670_v35 }
  0x32   : > { %476 = vmatmul.mubr.msk.f32.vlgmr.msra.gmra.mxu0 %vm75_vm0, %v614_v40 }
  0x34   : > { %183 = vmatpush1.xpose.msra.mxu1 %v668_v34 }
  0x35   : > { %184 = vmatprep.subr.mxu1 %v666_v33 }
  0x36   : > { %s549_s16 = spop.drf %548 }
  0x37   : > { %s232_s17 = ssub.s32 0, %s549_s16 }
  0x38   : > { %185 = vmatpush1.xpose.msra.mxu1 %v664_v32  ;;  %s786_s17 = smov (!%p227_p5, %s232_s17), %s549_s16 }
  0x39   : > { %p479_p6 = scmp.lt.s32.totalorder %s786_s17, 0  ;;  %s238_s18 = sadd.s32 50, %s786_s17 }
  0x3b   : > { %s788_s18 = smov (!%p479_p6, %s238_s18), %s786_s17 }
  0x3c   : > { %p480_p7 = scmp.ne.s32.totalorder %s788_s18, 1 }
  0xf2   : > { %v145_v42 = vpop.f32.mrf.mxu0 }
  0xf3   : > { %v146_v43 = vadd.f32 1e-16, %v145_v42 }
  0xf4   : > { %v147_v44 = vpop.f32.mrf.mxu0 }
  0xf5   : > { %v148_v45 = vadd.f32 1e-16, %v147_v44  ;;  %550 = vrcp.f32 %v146_v43 }
  0xf7   : > { %552 = vrcp.f32 %v148_v45 }
 0x102   : > { %v551_v46 = vpop.eup %550 }
 0x103   : > { %v712_v49 = vmul.f32 0.00390625, %v551_v46 }
 0x104   : > { %v553_v47 = vpop.eup %552 }
 0x105   : > { %v710_v48 = vmul.f32 0.00390625, %v553_v47 }
 0x107   : > { %218 = vmatprep.mubr.f32.mxu1 %v710_v48 }
 0x108   : > { %219 = vmatmul.mubr.f32.vlgmr.msra.gmra.mxu1 %v712_v49 }
 0x1c8   : > { %v220_v50 = vpop.f32.mrf.mxu1 }
 0x1c9   : > { %v221_v51 = vadd.f32 1e-16, %v220_v50 }
 0x1ca   : > { %v222_v52 = vpop.f32.mrf.mxu1 }
 0x1cb   : > { %554 = vrcp.f32 %v221_v51 }
 0x1d7   : > { %243 = sbr.rel (%p480_p7) target bundleno = 888 (0x378), region = 20 }
 0x1d8   : > { %v555_v53 = vpop.eup %554 }
 0x1d9   : > { %v724_v40 = vmul.f32 0.03125, %v555_v53  }
 0x1db   : > { %v783_v54 = vmov %v724_v40 }
 0x1dc   : > { %271 = vmatprep.subr.mxu0 %v678_v39  ;;  %v624_v55 = vmov 0.0   ;;  %vm324_vm1 = vcmask 1040384  }
 0x1dd   : > { %272 = vmatpush1.msra.mxu0 %v676_v38  ;;  %311 = vmatprep.mubr.f32.mxu0 %v624_v55 }
 0x1de   : > { %273 = vmatprep.subr.mxu0 %v674_v37 }
 0x1df   : > { %274 = vmatpush1.msra.mxu0 %v672_v36 }
 0x1e0   : > { %275 = vmatprep.subr.mxu0 %v670_v35 }
 0x1e1   : > { %276 = vmatpush1.msra.mxu0 %v668_v34 }
 0x1e2   : > { %277 = vmatprep.subr.mxu0 %v666_v33 }
 0x1e3   : > { %278 = vmatpush1.msra.mxu0 %v664_v32 }
 0x1e4   : > { %481 = vmatmul.mubr.msk.f32.vlgmr.msra.gmra.mxu0 %vm75_vm0, %v783_v54 }
 0x2a4   : > { %v313_v56 = vpop.f32.mrf.mxu0 }
 0x2a5   : > { %v318_v57 = vmul.f32 %v313_v56, %v712_v49 }
 0x2a6   : > { %v315_v58 = vpop.f32.mrf.mxu0 }
 0x2a7   : > { %v482_v59 = vadd.f32 -0.00390625, %v318_v57  ;;  %v319_v60 = vmul.f32 %v315_v58, %v710_v48 }
 0x2a9   : > { %v322_v61 = vand.u32 2147483647, %v482_v59  ;;  %v483_v62 = vadd.f32 -0.00390625, %v319_v60 }
 0x2ab   : > { %v323_v63 = vand.u32 2147483647, %v483_v62  ;;  %v325_v6 = vsel %vm324_vm1, %v322_v61, 0.0 }
 0x2ad   : > { %v326_v7 = vsel %vm324_vm1, %v323_v63, 0.0 }
 0x2ae   : > { %v327_v8 = vadd.f32 %v326_v7, %v325_v6 }
 0x2b0   : > { %328 = vadd.xlane.f32.xlu0 %v327_v8 }
 0x339   : > { %v329_v11 = vpop.xlane.xlu0 %328 }
 0x33a   : > { %v330_v12 = vrot.slane %v329_v11, 4 }
 0x33c   : > { %v331_v13 = vadd.f32 %v330_v12, %v329_v11 }
 0x33e   : > { %v332_v14 = vrot.slane %v331_v13, 2 }
 0x340   : > { %v333_v15 = vadd.f32 %v332_v14, %v331_v13 }
 0x342   : > { %v334_v16 = vrot.slane %v333_v15, 1 }
 0x344   : > { %v335_v17 = vadd.f32 %v334_v16, %v333_v15 }
 0x346   : > { %485 = vpush %v335_v17 }
 0x377   : > { %s486_s19 = spop %485  }
 0x378 PF: > { %s790_s13 = smov (!%p480_p7, %s610_s13), %s618_s19  ;;  %p70_p9 = scmp.lt.s32.totalorder %s717_s0, 5000  ;;  %v784_v40 = vmov %v783_v54  ;;  %s618_s19 = sphi %s727_s19, %s486_s19  }
 0x379   : > { %p69_p8 = scmp.gt.f32.partialorder %s790_s13, 0.005 }
 0x37b   : > { %p71_p10 = pnand %p70_p9, %p69_p8 }
 0x37c   :  { %v349_v18 = vmul.f32 (%p71_p10), %v678_v39, %v657_v10  ;;  %v348_v19 = vmul.f32 (%p71_p10), %v676_v38, %v655_v9  ;;  %v347_v20 = vmul.f32 (%p71_p10), %v674_v37, %v650_v5  ;;  %v346_v21 = vmul.f32 (%p71_p10), %v672_v36, %v648_v4  ;;  %s626_s22 = smov (%p71_p10), [#allocation5]  }
 0x37d   :  { %74 = sbr.rel (!%p71_p10) target bundleno = 42 (0x2a), region = 44  ;;  %v345_v22 = vmul.f32 (%p71_p10), %v670_v35, %v646_v3  ;;  %v344_v23 = vmul.f32 (%p71_p10), %v668_v34, %v644_v2  ;;  %v625_v24 = vmov (%p71_p10), 0.0   ;;  %v343_v9 = vmul.f32 (%p71_p10), %v666_v33, %v642_v1 }
 0x37e   :  { %378 = vmatprep.subr.mxu0 (%p71_p10), %v349_v18  ;;  %418 = vmatprep.mubr.f32.mxu0 (%p71_p10), %v625_v24  ;;  %v342_v5 = vmul.f32 (%p71_p10), %v664_v32, %v640_v0  ;;  %vm427_vm2 = vcmask (%p71_p10), 1040384  }
 0x37f   :  { %379 = vmatpush1.msra.mxu0 (%p71_p10), %v348_v19 }
 0x380   :  { %380 = vmatprep.subr.mxu0 (%p71_p10), %v347_v20 }
 0x381   :  { %381 = vmatpush1.msra.mxu0 (%p71_p10), %v346_v21 }
 0x382   :  { %382 = vmatprep.subr.mxu0 %v345_v22 }
 0x383   :  { %383 = vmatpush1.msra.mxu0 %v344_v23 }
 0x384   :  { %384 = vmatprep.subr.mxu0 %v343_v9 }
 0x385   :  { %385 = vmatpush1.msra.mxu0 %v342_v5 }
 0x386   :  { %484 = vmatmul.mubr.msk.f32.vlgmr.msra.gmra.mxu0 %vm75_vm0, %v783_v54 }
 0x446   :  { %v420_v3 = vpop.f32.mrf.mxu0 }
 0x447   :  { %v425_v2 = vmul.f32 %v420_v3, %v712_v49 }
 0x448   :  { %v422_v4 = vpop.f32.mrf.mxu0 }
 0x449   :  { %v426_v10 = vmul.f32 %v422_v4, %v710_v48  ;;  %v428_v25 = vsel %vm427_vm2, %v425_v2, 0.0 }
 0x44b   :  { %v429_v1 = vsel %vm427_vm2, %v426_v10, 0.0 }
 0x44c   :  { %v430_v26 = vadd.f32 %v429_v1, %v428_v25 }
 0x44e   :  { %431 = vadd.xlane.f32.xlu0 %v430_v26 }
 0x4d7   :  { %v432_v27 = vpop.xlane.xlu0 %431 }
 0x4d8   :  { %v433_v0 = vrot.slane %v432_v27, 4 }
 0x4da   :  { %v434_v28 = vadd.f32 %v433_v0, %v432_v27 }
 0x4dc   :  { %v435_v29 = vrot.slane %v434_v28, 2 }
 0x4de   :  { %v436_v30 = vadd.f32 %v435_v29, %v434_v28 }
 0x4e0   :  { %v437_v31 = vrot.slane %v436_v30, 1 }
 0x4e2   :  { %v438_v32 = vadd.f32 %v437_v31, %v436_v30 }
 0x4e4   :  { %487 = vpush %v438_v32 }
 0x515   :  { %s488_s20 = spop %487 }
 0x516   :  { %s440_s21 = smul.f32 100.0, %s488_s20 }
 0x518   :  { %442 = sst [smem:[#allocation5]] %s440_s21 }
 0x519   :  { %450 = dma.smem_to_hbm %s626_s22, 16, %s782_s1, [#allocation4]  }
 0x51a   :  { %602 = dma.done.wait [#allocation4], 16  }
 0x51b   :  { %603 = vsyncadd [#allocation4], 4294967280 }
 0x51c   :  { %454 = sfence }
 0x51d   :  { %455 = vsyncpa [#allocation3], 1 }
 0x51e   :  { %456 = vsyncpa [#allocation4], 1 }

</bundles_post_ra>
